<compile_context>
chip_gen: v7x
topology: tpu7x:2x2x1
jax: 0.10.0
libtpu: 0.0.40
codegen_flags: <defaults>
</compile_context>

<pallas_src>
import jax
import jax.numpy as jnp
from jax.experimental import pallas as pl
from jax.experimental.pallas import tpu as pltpu

T_HOURS = 24 * 7        # 168
LANE = 128


def _ceil_to(x: int, m: int) -> int:
    return -(-x // m) * m


# ---------------------------------------------------------------------------
# Kernel: one batch tile
# ---------------------------------------------------------------------------
def poi_encoder_kernel(x_ref, emb_f_ref, w1_ref, b1_ref, w2_ref, bias_f_ref,
                       out_ref):
    """
    x_ref     : [TB, F+1]   packed (coords | temporal | cat_id-as-float)
    emb_f_ref : [n_cat, Hp] embedding table, pre-folded with Wf_cat
    w1_ref    : [F+1, 2Hp]  block-diag(ws1, wt1); trailing cat-id row is zero
    b1_ref    : [1, 2Hp]    (bs1 | bt1), zero in the padding lanes
    w2_ref    : [2Hp, Hp]   stacked (ws2@Wf_sp, wt2@Wf_tp) on the H blocks
    bias_f_ref: [1, Hp]     bf + bs2@Wf_sp + bt2@Wf_tp
    out_ref   : [TB, Hp]
    """
    x = x_ref[...]
    tb, fp1 = x.shape
    n_cat = emb_f_ref.shape[0]

    # --- category embedding (pre-folded with the fusion weights) -----------
    # one-hot @ table on the MXU; ids are small ints stored exactly as floats.
    ids = x[:, fp1 - 1:fp1]                                         # [TB, 1]
    iota = jax.lax.broadcasted_iota(jnp.int32, (tb, n_cat), 1).astype(x.dtype)
    onehot = (iota == ids).astype(emb_f_ref.dtype)
    out = jnp.dot(onehot, emb_f_ref[...], preferred_element_type=jnp.float32)

    # --- spatial + temporal first layers: one block-diagonal matmul --------
    # (the trailing cat-id column multiplies an all-zero weight row.)
    h = jnp.dot(x, w1_ref[...], preferred_element_type=jnp.float32)
    h = jnp.maximum(h + b1_ref[...], 0.0)                           # [TB, 2Hp]

    # --- both second layers (already folded with the fusion Linear) --------
    w2 = w2_ref[...]
    out = out + jnp.dot(h.astype(w2.dtype), w2,
                        preferred_element_type=jnp.float32)

    out_ref[...] = out + bias_f_ref[...]


# ---------------------------------------------------------------------------
# One-time parameter folding (hoisted out of the per-call path)
# ---------------------------------------------------------------------------
def fold_params(params, *, compute_dtype=jnp.float32):
    """Fold the fusion Linear into the branch weights, fuse the two branch
    first layers into one block-diagonal matrix, and zero-pad the hidden dim
    to a lane-dense multiple of 128.  Call once per parameter update."""
    emb = params["emb"]
    n_cat, H = emb.shape
    T = params["wt1"].shape[0]
    F1 = 2 + T + 1                      # coords + temporal + cat-id column
    Hp = _ceil_to(H, LANE)
    f32 = jnp.float32

    # first layers: block-diag(ws1, wt1); cat-id row stays zero
    w1 = jnp.zeros((F1, 2 * Hp), f32)
    w1 = w1.at[0:2, 0:H].set(params["ws1"])
    w1 = w1.at[2:2 + T, Hp:Hp + H].set(params["wt1"])

    b1 = jnp.zeros((1, 2 * Hp), f32)
    b1 = b1.at[:, 0:H].set(params["bs1"])
    b1 = b1.at[:, Hp:Hp + H].set(params["bt1"])

    # second layers, folded with the fusion Linear, stacked on the 2Hp axis
    w2 = jnp.zeros((2 * Hp, Hp), f32)
    w2 = w2.at[0:H, 0:H].set(params["ws2"] @ params["wf_sp"])
    w2 = w2.at[Hp:Hp + H, 0:H].set(params["wt2"] @ params["wf_tp"])

    emb_f = jnp.zeros((n_cat, Hp), f32)
    emb_f = emb_f.at[:, 0:H].set(emb @ params["wf_cat"])

    bias_f = jnp.zeros((1, Hp), f32)
    bias_f = bias_f.at[:, 0:H].set(params["bf"]
                                   + params["bs2"] @ params["wf_sp"]
                                   + params["bt2"] @ params["wf_tp"])

    return dict(
        emb_f=emb_f.astype(compute_dtype),
        w1=w1.astype(compute_dtype),
        b1=b1,                                   # biases / add path stay f32
        w2=w2.astype(compute_dtype),
        bias_f=bias_f,
        hidden_dim=H, n_categories=n_cat, temporal_dim=T,
        compute_dtype=compute_dtype,
    )


# ---------------------------------------------------------------------------
# Per-call wrapper
# ---------------------------------------------------------------------------
def poi_encoder(cat_ids, coords, temporal, folded, *, block_b=512,
                batch_buffering=2, trim=True):
    """cat_ids: [B,1] int32, coords: [B,2] f32, temporal: [B,168] f32.
    `folded` comes from fold_params().  Returns [B, H] f32 (or the lane-dense
    padded [Bp, Hp] slab when trim=False)."""
    B = cat_ids.shape[0]
    H = folded["hidden_dim"]
    T = folded["temporal_dim"]
    n_cat = folded["n_categories"]
    Hp = folded["bias_f"].shape[1]
    F1 = 2 + T + 1
    cdt = folded["compute_dtype"]
    itemsize = jnp.dtype(cdt).itemsize

    # ---- pack the per-row inputs into a single lane-contiguous slab -------
    x = jnp.concatenate(
        [coords.astype(cdt), temporal.astype(cdt), cat_ids.astype(cdt)],
        axis=1)                                               # [B, F1]

    # ---- batch tile: big enough to amortize the ~0.35us/step overhead, but
    #      capped so >=4 grid steps survive on large batches (megacore). -----
    tb = min(block_b, _ceil_to(B, 8))
    quarter = _ceil_to(-(-B // 4), 8)
    if quarter >= 128:
        tb = min(tb, quarter)
    tb = max(_ceil_to(tb, 8), 8)
    Bp = _ceil_to(B, tb)
    if Bp != B:
        x = jnp.pad(x, ((0, Bp - B), (0, 0)))
    grid = (Bp // tb,)

    def const_spec(shape):
        # weights: resident across the whole grid; single-buffered.
        return pl.BlockSpec(shape, lambda i: (0, 0),
                            pipeline_mode=pl.Buffered(1))

    in_specs = [
        pl.BlockSpec((tb, F1), lambda i: (i, 0),
                     pipeline_mode=pl.Buffered(batch_buffering)),
        const_spec((n_cat, Hp)),          # emb_f
        const_spec((F1, 2 * Hp)),         # w1 (block-diag first layers)
        const_spec((1, 2 * Hp)),          # b1
        const_spec((2 * Hp, Hp)),         # w2 (stacked, fusion-folded)
        const_spec((1, Hp)),              # bias_f
    ]
    out_spec = pl.BlockSpec((tb, Hp), lambda i: (i, 0))

    # ---- realistic VMEM budget: single-buffered weights + pipelined tiles --
    weight_bytes = ((n_cat * Hp + F1 * 2 * Hp + 2 * Hp * Hp) * itemsize
                    + (2 * Hp + Hp) * 4)
    tile_bytes = (batch_buffering * tb * F1 * itemsize + 2 * tb * Hp * 4)
    vmem_limit = int(min(weight_bytes + tile_bytes + (16 << 20), 32 << 20))

    flops = 2 * Bp * (n_cat * Hp + F1 * 2 * Hp + 2 * Hp * Hp)
    bytes_accessed = Bp * F1 * itemsize + weight_bytes + Bp * Hp * 4
    cost = pl.CostEstimate(flops=flops, transcendentals=0,
                           bytes_accessed=bytes_accessed)

    out = pl.pallas_call(
        poi_encoder_kernel,
        out_shape=jax.ShapeDtypeStruct((Bp, Hp), jnp.float32),
        grid=grid,
        in_specs=in_specs,
        out_specs=out_spec,
        compiler_params=pltpu.CompilerParams(
            dimension_semantics=("parallel",),
            vmem_limit_bytes=vmem_limit,
        ),
        cost_estimate=cost,
    )(x, folded["emb_f"], folded["w1"], folded["b1"], folded["w2"],
      folded["bias_f"])

    if trim:
        return out[:B, :H]
    return out


# ---------------------------------------------------------------------------
# Synthetic params + pure-JAX reference (unfolded), for validation
# ---------------------------------------------------------------------------
def init_params(key, n_categories, hidden_dim):
    """PyTorch-style init, stored as [in, out] so the math is x @ W.
    The fusion Linear(3H, H) weight is kept as three H-blocks."""
    H = hidden_dim
    ks = jax.random.split(key, 6)

    def lin(k, fan_in, fan_out):
        kw, kb = jax.random.split(k)
        bound = 1.0 / jnp.sqrt(fan_in)
        w = jax.random.uniform(kw, (fan_in, fan_out), jnp.float32, -bound, bound)
        b = jax.random.uniform(kb, (1, fan_out), jnp.float32, -bound, bound)
        return w, b

    emb = jax.random.normal(ks[0], (n_categories, H), jnp.float32)
    ws1, bs1 = lin(ks[1], 2, H)
    ws2, bs2 = lin(ks[2], H, H)
    wt1, bt1 = lin(ks[3], T_HOURS, H)
    wt2, bt2 = lin(ks[4], H, H)
    wf, bf = lin(ks[5], 3 * H, H)
    return dict(
        emb=emb,
        ws1=ws1, bs1=bs1, ws2=ws2, bs2=bs2,
        wt1=wt1, bt1=bt1, wt2=wt2, bt2=bt2,
        wf_cat=wf[0:H], wf_sp=wf[H:2 * H], wf_tp=wf[2 * H:3 * H], bf=bf,
    )


def reference_forward(cat_ids, coords, temporal, params):
    """Plain-JAX replica of POIEncoder.forward (unfolded params), batched."""
    cat_emb = params["emb"][cat_ids[:, 0]]
    h_s = jnp.maximum(coords @ params["ws1"] + params["bs1"], 0.0)
    spatial = h_s @ params["ws2"] + params["bs2"]
    h_t = jnp.maximum(temporal @ params["wt1"] + params["bt1"], 0.0)
    temporal_e = h_t @ params["wt2"] + params["bt2"]
    combined = jnp.concatenate([cat_emb, spatial, temporal_e], axis=-1)
    wf = jnp.concatenate([params["wf_cat"], params["wf_sp"], params["wf_tp"]],
                         axis=0)
    return combined @ wf + params["bf"]


if __name__ == "__main__":
    n_categories, hidden_dim, B = 16, 32, 12

    key = jax.random.PRNGKey(0)
    k_param, k_cat, k_coord, k_temp = jax.random.split(key, 4)

    params = init_params(k_param, n_categories, hidden_dim)
    cat_ids = jax.random.randint(k_cat, (B, 1), 0, n_categories, jnp.int32)
    coords = jax.random.uniform(k_coord, (B, 2), jnp.float32, -90.0, 90.0)
    temporal = jax.random.uniform(k_temp, (B, 24 * 7), jnp.float32)

    # fold / pad once (per parameter update), outside the per-call path
    folded = fold_params(params)

    ref = reference_forward(cat_ids, coords, temporal, params)

    # default path: one big batch tile
    out = jax.block_until_ready(poi_encoder(cat_ids, coords, temporal, folded))
    assert out.shape == (B, hidden_dim)
    assert jnp.allclose(out, ref, atol=2e-3, rtol=2e-3), (
        "mismatch vs reference (default tile), max abs err = %e"
        % float(jnp.max(jnp.abs(out - ref))))

    # small batch tile just to exercise batch padding + a multi-step grid
    out2 = jax.block_until_ready(
        poi_encoder(cat_ids, coords, temporal, folded, block_b=8))
    assert jnp.allclose(out2, ref, atol=2e-3, rtol=2e-3), (
        "mismatch vs reference (tiled), max abs err = %e"
        % float(jnp.max(jnp.abs(out2 - ref))))

    print("KERNEL_OK")
</pallas_src>

<mosaic_0001>
module attributes {stable_mosaic.version = 11 : i64} {
  func.func @poi_encoder_kernel(%arg0: i32, %arg1: memref<16x171xf32, #tpu.memory_space<vmem>>, %arg2: memref<16x128xf32, #tpu.memory_space<vmem>>, %arg3: memref<171x256xf32, #tpu.memory_space<vmem>>, %arg4: memref<1x256xf32, #tpu.memory_space<vmem>>, %arg5: memref<256x128xf32, #tpu.memory_space<vmem>>, %arg6: memref<1x128xf32, #tpu.memory_space<vmem>>, %arg7: memref<16x128xf32, #tpu.memory_space<vmem>>) attributes {dimension_semantics = [#tpu.dimension_semantics<parallel>], iteration_bounds = array<i64: 1>, scalar_prefetch = 0 : i64, scratch_operands = 0 : i64, tpu.core_type = #tpu.core_type<tc>, window_params = [{pipeline_mode = #tpu.pipeline_mode<double_buffered>, transform_indices = @transform_0, window_bounds = array<i64: 16, 171>}, {pipeline_mode = #tpu.pipeline_mode<synchronous>, transform_indices = @transform_1, window_bounds = array<i64: 16, 128>}, {pipeline_mode = #tpu.pipeline_mode<synchronous>, transform_indices = @transform_2, window_bounds = array<i64: 171, 256>}, {pipeline_mode = #tpu.pipeline_mode<synchronous>, transform_indices = @transform_3, window_bounds = array<i64: 1, 256>}, {pipeline_mode = #tpu.pipeline_mode<synchronous>, transform_indices = @transform_4, window_bounds = array<i64: 256, 128>}, {pipeline_mode = #tpu.pipeline_mode<synchronous>, transform_indices = @transform_5, window_bounds = array<i64: 1, 128>}, {transform_indices = @transform_6, window_bounds = array<i64: 16, 128>}]} {
    %c0 = arith.constant 0 : index
    %c0_0 = arith.constant 0 : index
    %0 = vector.load %arg1[%c0, %c0_0] : memref<16x171xf32, #tpu.memory_space<vmem>>, vector<16x171xf32>
    %1 = vector.extract_strided_slice %0 {offsets = [0, 170], sizes = [16, 1], strides = [1, 1]} : vector<16x171xf32> to vector<16x1xf32>
    %2 = tpu.iota {dimensions = array<i32: 1>} : vector<16x16xi32>
    %3 = arith.sitofp %2 : vector<16x16xi32> to vector<16x16xf32>
    %4 = vector.broadcast %1 : vector<16x1xf32> to vector<16x16xf32>
    %5 = arith.cmpf oeq, %3, %4 : vector<16x16xf32>
    %6 = arith.extui %5 : vector<16x16xi1> to vector<16x16xi32>
    %7 = arith.sitofp %6 : vector<16x16xi32> to vector<16x16xf32>
    %c0_1 = arith.constant 0 : index
    %c0_2 = arith.constant 0 : index
    %8 = vector.load %arg2[%c0_1, %c0_2] : memref<16x128xf32, #tpu.memory_space<vmem>>, vector<16x128xf32>
    %cst = arith.constant dense<0.000000e+00> : vector<16x128xf32>
    %9 = tpu.matmul %7, %8, %cst {dimension_numbers = #tpu.dot_dimension_numbers<[1], [0], [0], [1], [0, 0, 1, 1], [], []>} : vector<16x16xf32>, vector<16x128xf32>, vector<16x128xf32> -> vector<16x128xf32>
    %c0_3 = arith.constant 0 : index
    %c0_4 = arith.constant 0 : index
    %10 = vector.load %arg3[%c0_3, %c0_4] : memref<171x256xf32, #tpu.memory_space<vmem>>, vector<171x256xf32>
    %cst_5 = arith.constant dense<0.000000e+00> : vector<16x256xf32>
    %11 = tpu.matmul %0, %10, %cst_5 {dimension_numbers = #tpu.dot_dimension_numbers<[1], [0], [0], [1], [0, 0, 1, 1], [], []>} : vector<16x171xf32>, vector<171x256xf32>, vector<16x256xf32> -> vector<16x256xf32>
    %c0_6 = arith.constant 0 : index
    %c0_7 = arith.constant 0 : index
    %12 = vector.load %arg4[%c0_6, %c0_7] : memref<1x256xf32, #tpu.memory_space<vmem>>, vector<1x256xf32>
    %13 = vector.broadcast %12 : vector<1x256xf32> to vector<16x256xf32>
    %14 = arith.addf %11, %13 : vector<16x256xf32>
    %cst_8 = arith.constant 0.000000e+00 : f32
    %15 = vector.broadcast %cst_8 : f32 to vector<16x256xf32>
    %16 = arith.maximumf %14, %15 : vector<16x256xf32>
    %c0_9 = arith.constant 0 : index
    %c0_10 = arith.constant 0 : index
    %17 = vector.load %arg5[%c0_9, %c0_10] : memref<256x128xf32, #tpu.memory_space<vmem>>, vector<256x128xf32>
    %cst_11 = arith.constant dense<0.000000e+00> : vector<16x128xf32>
    %18 = tpu.matmul %16, %17, %cst_11 {dimension_numbers = #tpu.dot_dimension_numbers<[1], [0], [0], [1], [0, 0, 1, 1], [], []>} : vector<16x256xf32>, vector<256x128xf32>, vector<16x128xf32> -> vector<16x128xf32>
    %19 = arith.addf %9, %18 : vector<16x128xf32>
    %c0_12 = arith.constant 0 : index
    %c0_13 = arith.constant 0 : index
    %20 = vector.load %arg6[%c0_12, %c0_13] : memref<1x128xf32, #tpu.memory_space<vmem>>, vector<1x128xf32>
    %21 = vector.broadcast %20 : vector<1x128xf32> to vector<16x128xf32>
    %22 = arith.addf %19, %21 : vector<16x128xf32>
    %c0_14 = arith.constant 0 : index
    %c0_15 = arith.constant 0 : index
    %23 = vector.load %arg7[%c0_14, %c0_15] : memref<16x128xf32, #tpu.memory_space<vmem>>, vector<16x128xf32>
    tpu.vector_store %arg7[%c0_14, %c0_15], %22 {strides = array<i32>} : memref<16x128xf32, #tpu.memory_space<vmem>>, vector<16x128xf32>,
    return
  }
  func.func @transform_0(%arg0: i32) -> (i32, i32) {
    %c0_i32 = arith.constant 0 : i32
    %c0_i32_0 = arith.constant 0 : i32
    return %arg0, %c0_i32 : i32, i32
  }
  func.func @transform_1(%arg0: i32) -> (i32, i32) {
    %c0_i32 = arith.constant 0 : i32
    %c0_i32_0 = arith.constant 0 : i32
    %c0_i32_1 = arith.constant 0 : i32
    return %c0_i32, %c0_i32_0 : i32, i32
  }
  func.func @transform_2(%arg0: i32) -> (i32, i32) {
    %c0_i32 = arith.constant 0 : i32
    %c0_i32_0 = arith.constant 0 : i32
    %c0_i32_1 = arith.constant 0 : i32
    return %c0_i32, %c0_i32_0 : i32, i32
  }
  func.func @transform_3(%arg0: i32) -> (i32, i32) {
    %c0_i32 = arith.constant 0 : i32
    %c0_i32_0 = arith.constant 0 : i32
    %c0_i32_1 = arith.constant 0 : i32
    return %c0_i32, %c0_i32_0 : i32, i32
  }
  func.func @transform_4(%arg0: i32) -> (i32, i32) {
    %c0_i32 = arith.constant 0 : i32
    %c0_i32_0 = arith.constant 0 : i32
    %c0_i32_1 = arith.constant 0 : i32
    return %c0_i32, %c0_i32_0 : i32, i32
  }
  func.func @transform_5(%arg0: i32) -> (i32, i32) {
    %c0_i32 = arith.constant 0 : i32
    %c0_i32_0 = arith.constant 0 : i32
    %c0_i32_1 = arith.constant 0 : i32
    return %c0_i32, %c0_i32_0 : i32, i32
  }
  func.func @transform_6(%arg0: i32) -> (i32, i32) {
    %c0_i32 = arith.constant 0 : i32
    %c0_i32_0 = arith.constant 0 : i32
    return %arg0, %c0_i32 : i32, i32
  }
}

</mosaic_0001>

<bundles_post_ra>
// kernel: tpu_custom_call.1
= control target key start
LH: loop header
LB: loop body
LE: loop exit
PB: predicated region body
PF: predicated region fallthrough
CT: control target
= control target key end

     0   :  { %11 = vsyncpa [#allocation3], 0  ;;  %s878_s0 = inlined_call_operand.hbm [shape: f32[16,171], index: 0, kind: input, shape index: {}]   ;;  %s879_s1 = inlined_call_operand.hbm [shape: f32[16,128], index: 1, kind: input, shape index: {}]   ;;  %s880_s2 = inlined_call_operand.hbm [shape: f32[171,256], index: 2, kind: input, shape index: {}]   ;;  %s881_s3 = inlined_call_operand.vmem [shape: f32[1,256], index: 3, kind: input, shape index: {}]   ;;  %s882_s4 = inlined_call_operand.hbm [shape: f32[256,128], index: 4, kind: input, shape index: {}]   ;;  %s883_s5 = inlined_call_operand.vmem [shape: f32[1,128], index: 5, kind: input, shape index: {}]   ;;  %s884_s6 = inlined_call_operand.hbm [shape: f32[16,128], index: 6, kind: output, shape index: {}]  }
   0x1   :  { %12 = vsyncpa [#allocation6], 0 }
   0x2   :  { %13 = vsyncpa [#allocation9], 0 }
   0x3   :  { %14 = vsyncpa [#allocation4], 0  ;;  %s743_s21 = smov [#allocation5]   ;;  %s625_s25 = scalar_lea.hbm %s879_s1, 256 }
   0x4   :  { %s32_s22 = sshll.u32 %s743_s21, 4  ;;  %p626_p0 = scmp.ne.s32.totalorder %s879_s1, %s625_s25  ;;  %s33_s22 = int_to_ptr.vmem [resolvable:$true] %s32_s22 }
   0x5   :  { %p629_p1 = scmp.lt.u32.totalorder %s625_s25, %s879_s1 }
   0x7   :  { %p631_p2 = pnand %p629_p1, %p626_p0 }
   0x9   :  { %634 = shalt.err (!%p631_p2)
}
   0xa   :  { %s635_s30 = scalar_lea.vmem %s33_s22, 256  ;;  %p640_p4 = scmp.lt.s32.totalorder %s33_s22, %s33_s22 }
   0xb   :  { %p636_p3 = scmp.ne.s32.totalorder %s33_s22, %s635_s30  ;;  %p641_p5 = scmp.lt.s32.totalorder %s635_s30, %s635_s30 }
   0xd   :  { %p642_p6 = por %p641_p5, %p640_p4 }
   0xf   :  { %p643_p7 = pnand %p642_p6, %p636_p3 }
  0x11   :  { %646 = shalt.err (!%p643_p7)
}
  0x12   :  { %s744_s7 = smov 128   ;;  %s745_s8 = smov 8  }
  0x13   :  { %38 = dma.hbm_to_vmem [thread:$0]  %s879_s1, 256, %s33_s22, [#allocation6], %s744_s7, %s744_s7, %s745_s8  }
  0x14   :  { %s746_s11 = smov [#allocation2]   ;;  %s647_s15 = scalar_lea.hbm %s878_s0, 512 }
  0x15   :  { %s20_s12 = sshll.u32 %s746_s11, 4  ;;  %p648_p8 = scmp.ne.s32.totalorder %s878_s0, %s647_s15  ;;  %s21_s12 = int_to_ptr.vmem [resolvable:$true] %s20_s12 }
  0x16   :  { %p651_p9 = scmp.lt.u32.totalorder %s647_s15, %s878_s0 }
  0x18   :  { %p653_p10 = pnand %p651_p9, %p648_p8 }
  0x1a   :  { %656 = shalt.err (!%p653_p10)
}
  0x1b   :  { %s657_s20 = scalar_lea.vmem %s21_s12, 512  ;;  %p662_p12 = scmp.lt.s32.totalorder %s21_s12, %s21_s12 }
  0x1c   :  { %p658_p11 = scmp.ne.s32.totalorder %s21_s12, %s657_s20  ;;  %p663_p13 = scmp.lt.s32.totalorder %s657_s20, %s657_s20 }
  0x1e   :  { %p664_p0 = por %p663_p13, %p662_p12 }
  0x20   :  { %p665_p1 = pnand %p664_p0, %p658_p11 }
  0x22   :  { %668 = shalt.err (!%p665_p1)
}
  0x23   :  { %s747_s1 = smov 256   ;;  %s748_s21 = smov 16  }
  0x24   :  { %26 = dma.hbm_to_vmem [thread:$0]  %s878_s0, 512, %s21_s12, [#allocation3], %s747_s1, %s747_s1, %s748_s21  }
  0x25   :  { %s749_s24 = smov [#allocation7]   ;;  %s750_s26 = smov [#allocation8]  }
  0x26   :  { %s44_s25 = sshll.u32 %s749_s24, 4  ;;  %s58_s27 = sshll.u32 %s750_s26, 4  ;;  %s45_s25 = int_to_ptr.vmem [resolvable:$true] %s44_s25  ;;  %s817_s27 = int_to_ptr.vmem [resolvable:$true] %s58_s27 }
  0x27   :  { %s669_s30 = scalar_lea.hbm %s880_s2, 5632 }
  0x28   :  { %p670_p2 = scmp.ne.s32.totalorder %s880_s2, %s669_s30  ;;  %p673_p3 = scmp.lt.u32.totalorder %s669_s30, %s880_s2 }
  0x2a   :  { %p675_p4 = pnand %p673_p3, %p670_p2 }
  0x2c   :  { %678 = shalt.err (!%p675_p4)
}
  0x2d   :  { %s679_s0 = scalar_lea.vmem %s45_s25, 5632  ;;  %p684_p6 = scmp.lt.s32.totalorder %s45_s25, %s45_s25 }
  0x2e   :  { %p680_p5 = scmp.ne.s32.totalorder %s45_s25, %s679_s0  ;;  %p685_p7 = scmp.lt.s32.totalorder %s679_s0, %s679_s0 }
  0x30   :  { %p686_p8 = por %p685_p7, %p684_p6 }
  0x32   :  { %p687_p9 = pnand %p686_p8, %p680_p5 }
  0x34   :  { %690 = shalt.err (!%p687_p9)
}
  0x35   :  { %50 = dma.hbm_to_vmem [thread:$0]  %s880_s2, 5632, %s45_s25, [#allocation6], %s747_s1, %s747_s1, %s748_s21  }
  0x36   :  { %s691_s17 = scalar_lea.hbm %s882_s4, 4096 }
  0x37   :  { %p692_p10 = scmp.ne.s32.totalorder %s882_s4, %s691_s17  ;;  %p695_p11 = scmp.lt.u32.totalorder %s691_s17, %s882_s4 }
  0x39   :  { %p697_p12 = pnand %p695_p11, %p692_p10 }
  0x3b   :  { %700 = shalt.err (!%p697_p12)
}
  0x3c   :  { %s701_s23 = scalar_lea.vmem %s817_s27, 4096  ;;  %p706_p0 = scmp.lt.s32.totalorder %s817_s27, %s817_s27 }
  0x3d   :  { %p702_p13 = scmp.ne.s32.totalorder %s817_s27, %s701_s23  ;;  %p707_p1 = scmp.lt.s32.totalorder %s701_s23, %s701_s23 }
  0x3f   :  { %p708_p2 = por %p707_p1, %p706_p0 }
  0x41   :  { %p709_p3 = pnand %p708_p2, %p702_p13 }
  0x43   :  { %712 = shalt.err (!%p709_p3)
}
  0x44   :  { %64 = dma.hbm_to_vmem [thread:$0]  %s882_s4, 4096, %s817_s27, [#allocation9], %s744_s7, %s744_s7, %s745_s8  }
  0x45   :  { %735 = dma.done.wait [#allocation3], 512  }
  0x46   :  { %736 = vsyncadd [#allocation3], 4294966784 }
  0x47   :  { %737 = dma.done.wait [#allocation6], 5888  }
  0x48   :  { %738 = vsyncadd [#allocation6], 4294961408 }
  0x49   :  { %739 = dma.done.wait [#allocation9], 4096  }
  0x4a   :  { %740 = vsyncadd [#allocation9], 4294963200  ;;  %v751_v0 = vmov 42   ;;  %v105_v1 = vld [vmem:[#allocation7 + $0x8] sm:$0xff]  ;;  %v107_v2 = vld [vmem:[#allocation7 + $0x18] sm:$0xff]  ;;  %vm160_vm0 = vcmask 351232  }
  0x4b   :  { %624 = vset.pattern.permute.xlu0 %v751_v0  ;;  %v104_v3 = vld [vmem:[#allocation7] sm:$0xff]  ;;  %v530_v4 = vpack.c.bf16 %v107_v2, %v105_v1  ;;  %v106_v5 = vld [vmem:[#allocation7 + $0x10] sm:$0xff]  ;;  %v109_v6 = vld [vmem:[#allocation7 + $0x28] sm:$0xff]  ;;  %vm165_vm1 = vcmask 1042432   ;;  %vm752_vm2 = vmmov 1   ;;  %vm360_vm5 = vcmask 130048  }
  0x4c   :  { %v111_v7 = vld [vmem:[#allocation7 + $0x38] sm:$0xff]  ;;  %v532_v8 = vpack.c.bf16 %v106_v5, %v104_v3  ;;  %v108_v10 = vld [vmem:[#allocation7 + $0x20] sm:$0xff]  ;;  %v110_v11 = vld [vmem:[#allocation7 + $0x30] sm:$0xff]  ;;  %s754_s25 = smov [#allocation10]  }
  0x4d   :  { %v534_v9 = vpack.c.bf16 %v111_v7, %v109_v6  ;;  %v113_v12 = vld [vmem:[#allocation7 + $0x48] sm:$0xff]  ;;  %531 = vmatprep.subr.bf16.mxu0 %v530_v4  ;;  %v115_v13 = vld [vmem:[#allocation7 + $0x58] sm:$0xff]  ;;  %v536_v14 = vpack.c.bf16 %v110_v11, %v108_v10  ;;  %v112_v16 = vld [vmem:[#allocation7 + $0x40] sm:$0xff]  ;;  %s458_s26 = sshll.u32 %s754_s25, 4  ;;  %s459_s26 = int_to_ptr.vmem [resolvable:$true] %s458_s26 }
  0x4e   :  { %533 = vmatpush1.bf16.msra.mxu0 %v532_v8  ;;  %v538_v15 = vpack.c.bf16 %v115_v13, %v113_v12  ;;  %v114_v17 = vld [vmem:[#allocation7 + $0x50] sm:$0xff]  ;;  %v117_v18 = vld [vmem:[#allocation7 + $0x68] sm:$0xff]  ;;  %v119_v19 = vld [vmem:[#allocation7 + $0x78] sm:$0xff]  ;;  %s713_s27 = scalar_lea.vmem %s459_s26, 256  ;;  %p718_p5 = scmp.lt.s32.totalorder %s459_s26, %s459_s26 }
  0x4f   :  { %535 = vmatprep.subr.bf16.mxu0 %v534_v9  ;;  %v540_v20 = vpack.c.bf16 %v114_v17, %v112_v16  ;;  %v542_v21 = vpack.c.bf16 %v119_v19, %v117_v18  ;;  %v116_v22 = vld [vmem:[#allocation7 + $0x60] sm:$0xff]  ;;  %v118_v23 = vld [vmem:[#allocation7 + $0x70] sm:$0xff]  ;;  %v121_v24 = vld [vmem:[#allocation7 + $0x88] sm:$0xff]  ;;  %p714_p4 = scmp.ne.s32.totalorder %s459_s26, %s713_s27  ;;  %p719_p6 = scmp.lt.s32.totalorder %s713_s27, %s713_s27 }
  0x50   :  { %v123_v25 = vld [vmem:[#allocation7 + $0x98] sm:$0xff]  ;;  %v544_v26 = vpack.c.bf16 %v118_v23, %v116_v22  ;;  %v120_v28 = vld [vmem:[#allocation7 + $0x80] sm:$0xff]  ;;  %v122_v29 = vld [vmem:[#allocation7 + $0x90] sm:$0xff] }
  0x51   :  { %v546_v27 = vpack.c.bf16 %v123_v25, %v121_v24  ;;  %v125_v30 = vld [vmem:[#allocation7 + $0xa8] sm:$0xff]  ;;  %v127_v31 = vld [vmem:[#allocation7 + $0xb8] sm:$0xff]  ;;  %v124_v33 = vld [vmem:[#allocation7 + $0xa0] sm:$0xff]  ;;  %v548_v35 = vpack.c.bf16 %v122_v29, %v120_v28  ;;  %p720_p7 = por %p719_p6, %p718_p5 }
  0x52   :  { %537 = vmatpush1.bf16.msra.mxu0 %v536_v14  ;;  %v80_v32 = vld [vmem:[#allocation2 + $0x8] sm:$0xff]  ;;  %v126_v34 = vld [vmem:[#allocation7 + $0xb0] sm:$0xff]  ;;  %v129_v36 = vld [vmem:[#allocation7 + $0xc8] sm:$0xff]  ;;  %v550_v42 = vpack.c.bf16 %v127_v31, %v125_v30 }
  0x53   :  { %539 = vmatprep.subr.bf16.mxu0 %v538_v15  ;;  %476 = vmatprep.mubr.msk.f32.mxu0 %vm160_vm0, %v80_v32  ;;  %v131_v37 = vld [vmem:[#allocation7 + $0xd8] sm:$0xff]  ;;  %v852_v38 = vld [vmem:[#allocation2 + $0x18] sm:$0xff]  ;;  %v269_v39 = vld [vmem:[#allocation8 + $0x80] sm:$0xff]  ;;  %v552_v53 = vpack.c.bf16 %v126_v34, %v124_v33  ;;  %p721_p8 = pnand %p720_p7, %p714_p4 }
  0x54   :  { %88 = vperm.xlu0 %624, %v80_v32   ;;  %v270_v40 = vld [vmem:[#allocation8 + $0x88] sm:$0xff]  ;;  %v253_v41 = vld [vmem:[#allocation8] sm:$0xff]  ;;  %v271_v45 = vld [vmem:[#allocation8 + $0x90] sm:$0xff]  ;;  %v554_v57 = vpack.c.bf16 %v131_v37, %v129_v36 }
  0x55   :  { %v576_v43 = vpack.c.bf16 %v270_v40, %v269_v39  ;;  %v254_v44 = vld [vmem:[#allocation8 + $0x8] sm:$0xff]  ;;  %v272_v46 = vld [vmem:[#allocation8 + $0x98] sm:$0xff]  ;;  %v255_v49 = vld [vmem:[#allocation8 + $0x10] sm:$0xff] }
  0x56   :  { %541 = vmatpush1.bf16.msra.mxu0 %v540_v20  ;;  %v578_v47 = vpack.c.bf16 %v254_v44, %v253_v41  ;;  %v580_v48 = vpack.c.bf16 %v272_v46, %v271_v45  ;;  %v256_v50 = vld [vmem:[#allocation8 + $0x18] sm:$0xff]  ;;  %v273_v51 = vld [vmem:[#allocation8 + $0xa0] sm:$0xff]  ;;  %v274_v52 = vld [vmem:[#allocation8 + $0xa8] sm:$0xff] }
  0x57   :  { %543 = vmatprep.subr.bf16.mxu0 %v542_v21  ;;  %577 = vmatprep.subr.bf16.mxu1 %v576_v43  ;;  %v128_v54 = vld [vmem:[#allocation7 + $0xc0] sm:$0xff]  ;;  %v130_v55 = vld [vmem:[#allocation7 + $0xd0] sm:$0xff]  ;;  %v582_v56 = vpack.c.bf16 %v256_v50, %v255_v49  ;;  %v133_v58 = vld [vmem:[#allocation7 + $0xe8] sm:$0xff]  ;;  %v584_v59 = vpack.c.bf16 %v274_v52, %v273_v51 }
  0x58   :  { %93 = vperm.xlu0 %624, %v852_v38   ;;  %579 = vmatpush3.bf16.msra.mxu1 %v578_v47  ;;  %v257_v60 = vld [vmem:[#allocation8 + $0x20] sm:$0xff]  ;;  %v258_v61 = vld [vmem:[#allocation8 + $0x28] sm:$0xff]  ;;  %v135_v62 = vld [vmem:[#allocation7 + $0xf8] sm:$0xff]  ;;  %v556_v1 = vpack.c.bf16 %v130_v55, %v128_v54 }
  0x59   :  { %581 = vmatprep.subr.bf16.mxu1 %v580_v48  ;;  %v275_v63 = vld [vmem:[#allocation8 + $0xb0] sm:$0xff]  ;;  %v276_v0 = vld [vmem:[#allocation8 + $0xb8] sm:$0xff]  ;;  %v132_v2 = vld [vmem:[#allocation7 + $0xe0] sm:$0xff]  ;;  %v586_v4 = vpack.c.bf16 %v258_v61, %v257_v60  ;;  %v558_v5 = vpack.c.bf16 %v135_v62, %v133_v58 }
  0x5a   :  { %545 = vmatpush1.bf16.msra.mxu0 %v544_v26  ;;  %v134_v3 = vld [vmem:[#allocation7 + $0xf0] sm:$0xff]  ;;  %v137_v6 = vld [vmem:[#allocation7 + $0x108] sm:$0xff]  ;;  %v588_v7 = vpack.c.bf16 %v276_v0, %v275_v63  ;;  %v260_v9 = vld [vmem:[#allocation8 + $0x38] sm:$0xff] }
  0x5b   :  { %547 = vmatprep.subr.bf16.mxu0 %v546_v27  ;;  %v259_v8 = vld [vmem:[#allocation8 + $0x30] sm:$0xff]  ;;  %v139_v10 = vld [vmem:[#allocation7 + $0x118] sm:$0xff]  ;;  %v277_v11 = vld [vmem:[#allocation8 + $0xc0] sm:$0xff]  ;;  %v560_v13 = vpack.c.bf16 %v134_v3, %v132_v2 }
  0x5c   :  { %583 = vmatpush3.bf16.msra.mxu1 %v582_v56  ;;  %v278_v12 = vld [vmem:[#allocation8 + $0xc8] sm:$0xff]  ;;  %v136_v14 = vld [vmem:[#allocation7 + $0x100] sm:$0xff]  ;;  %v138_v15 = vld [vmem:[#allocation7 + $0x110] sm:$0xff]  ;;  %v590_v16 = vpack.c.bf16 %v260_v9, %v259_v8  ;;  %v562_v17 = vpack.c.bf16 %v139_v10, %v137_v6 }
  0x5d   :  { %585 = vmatprep.subr.bf16.mxu1 %v584_v59  ;;  %v141_v18 = vld [vmem:[#allocation7 + $0x128] sm:$0xff]  ;;  %v592_v19 = vpack.c.bf16 %v278_v12, %v277_v11  ;;  %v261_v20 = vld [vmem:[#allocation8 + $0x40] sm:$0xff]  ;;  %v143_v22 = vld [vmem:[#allocation7 + $0x138] sm:$0xff]  ;;  %v564_v25 = vpack.c.bf16 %v138_v15, %v136_v14  ;;  %v83_v59 = vlaneseq }
  0x5e   :  { %549 = vmatpush1.bf16.msra.mxu0 %v548_v35  ;;  %v262_v21 = vld [vmem:[#allocation8 + $0x48] sm:$0xff]  ;;  %v279_v23 = vld [vmem:[#allocation8 + $0xd0] sm:$0xff]  ;;  %v280_v24 = vld [vmem:[#allocation8 + $0xd8] sm:$0xff]  ;;  %v566_v29 = vpack.c.bf16 %v143_v22, %v141_v18 }
  0x5f   :  { %551 = vmatprep.subr.bf16.mxu0 %v550_v42  ;;  %v140_v26 = vld [vmem:[#allocation7 + $0x120] sm:$0xff]  ;;  %v142_v27 = vld [vmem:[#allocation7 + $0x130] sm:$0xff]  ;;  %v594_v28 = vpack.c.bf16 %v262_v21, %v261_v20  ;;  %v145_v30 = vld [vmem:[#allocation7 + $0x148] sm:$0xff]  ;;  %v596_v31 = vpack.c.bf16 %v280_v24, %v279_v23  ;;  %v151_v60 = vshrl.u32 %v83_v59, 7  ;;  %v84_v0 = vand.u32 127, %v83_v59 }
  0x60   :  { %587 = vmatpush3.bf16.msra.mxu1 %v586_v4  ;;  %v263_v32 = vld [vmem:[#allocation8 + $0x50] sm:$0xff]  ;;  %v264_v33 = vld [vmem:[#allocation8 + $0x58] sm:$0xff]  ;;  %v281_v35 = vld [vmem:[#allocation8 + $0xe0] sm:$0xff]  ;;  %v568_v37 = vpack.c.bf16 %v142_v27, %v140_v26 }
  0x61   :  { %589 = vmatprep.subr.bf16.mxu1 %v588_v7  ;;  %v147_v34 = vld [vmem:[#allocation7 + $0x158] sm:$0x7]  ;;  %v282_v36 = vld [vmem:[#allocation8 + $0xe8] sm:$0xff]  ;;  %v144_v39 = vld [vmem:[#allocation7 + $0x140] sm:$0xff]  ;;  %v598_v40 = vpack.c.bf16 %v264_v33, %v263_v32  ;;  %v152_v61 = vsub.s32 0, %v151_v60  ;;  %v156_v62 = vsub.s32 1, %v151_v60 }
  0x62   :  { %553 = vmatpush1.bf16.msra.mxu0 %v552_v53  ;;  %v570_v41 = vpack.c.bf16 %v147_v34, %v145_v30  ;;  %v146_v42 = vld [vmem:[#allocation7 + $0x150] sm:$0x7]  ;;  %v600_v43 = vpack.c.bf16 %v282_v36, %v281_v35  ;;  %v265_v44 = vld [vmem:[#allocation8 + $0x60] sm:$0xff]  ;;  %v266_v45 = vld [vmem:[#allocation8 + $0x68] sm:$0xff] }
  0x63   :  { %555 = vmatprep.subr.bf16.mxu0 %v554_v57  ;;  %vm571_vm3 = vmpackc.low %vm165_vm1, %vm752_vm2  ;;  %v573_v46 = vpack.c.bf16 %v146_v42, %v144_v39  ;;  %v602_v47 = vpack.c.bf16 %v266_v45, %v265_v44  ;;  %v79_v48 = vld [vmem:[#allocation2] sm:$0xff]  ;;  %v81_v49 = vld [vmem:[#allocation2 + $0x10] sm:$0xff] }
  0x64   :  { %591 = vmatpush3.bf16.msra.mxu1 %v590_v16  ;;  %v283_v50 = vld [vmem:[#allocation8 + $0xf0] sm:$0xff]  ;;  %v284_v51 = vld [vmem:[#allocation8 + $0xf8] sm:$0xff]  ;;  %v753_v16 = vmov 0.0  }
  0x65   :  { %593 = vmatprep.subr.bf16.mxu1 %v592_v19  ;;  %v604_v52 = vpack.c.bf16 %v284_v51, %v283_v50  ;;  %v267_v53 = vld [vmem:[#allocation8 + $0x70] sm:$0xff]  ;;  %v268_v54 = vld [vmem:[#allocation8 + $0x78] sm:$0xff] }
  0x66   :  { %557 = vmatpush1.bf16.msra.mxu0 %v556_v1  ;;  %v606_v55 = vpack.c.bf16 %v268_v54, %v267_v53  ;;  %v102_v56 = vld [vmem:[#allocation5] sm:$0xff]  ;;  %v103_v57 = vld [vmem:[#allocation5 + $0x8] sm:$0xff] }
  0x67   :  { %559 = vmatprep.subr.bf16.mxu0 %v558_v5  ;;  %v608_v58 = vpack.c.bf16 %v103_v57, %v102_v56  ;;  %v85_v5 = vcvt.s32.f32 %v84_v0  ;;  %v480_v27 = vld [vmem:[%s883_s5] ss:$0 sm:$0xff] }
  0x68   :  { %595 = vmatpush3.bf16.msra.mxu1 %v594_v28 }
  0x69   :  { %597 = vmatprep.subr.bf16.mxu1 %v596_v31 }
  0x6a   :  { %561 = vmatpush1.bf16.msra.mxu0 %v560_v13 }
  0x6b   :  { %563 = vmatprep.subr.bf16.mxu0 %v562_v17 }
  0x6c   :  { %599 = vmatpush3.bf16.msra.mxu1 %v598_v40 }
  0x6d   :  { %601 = vmatprep.subr.bf16.mxu1 %v600_v43 }
  0x6e   :  { %565 = vmatpush1.bf16.msra.mxu0 %v564_v25 }
  0x6f   :  { %567 = vmatprep.subr.bf16.mxu0 %v566_v29 }
  0x70   :  { %603 = vmatpush3.bf16.msra.mxu1 %v602_v47 }
  0x71   :  { %605 = vmatprep.subr.bf16.mxu1 %v604_v52 }
  0x72   :  { %569 = vmatpush1.bf16.msra.mxu0 %v568_v37 }
  0x73   :  { %572 = vmatprep.subr.msk.bf16.mxu0 %vm571_vm3, %v570_v41 }
  0x74   :  { %607 = vmatpush3.bf16.msra.mxu1 %v606_v55 }
  0x75   :  { %609 = vmatprep.subr.bf16.mxu1 %v608_v58 }
  0x76   :  { %575 = vmatpush1.bf16.msk.msra.mxu0 %vm571_vm3, %v573_v46 }
  0x79   :  { %237 = vmatmul.mubr.f32.vlgmr.msra.gmra.mrb[0].mxu0 %v79_v48 }
  0x7a   :  { %477 = vmatprep.mubr.msk.f32.mxu0 %vm160_vm0, %v852_v38  ;;  %v148_v38 = vld [vmem:[%s881_s3] sm:$0x3] }
  0x7b   :  { %v153_v63 = vrot.slane %v148_v38, %v152_v61  ;;  %v157_v1 = vrot.slane %v148_v38, %v156_v62 }
  0x7d   :  { %243 = vmatmul.mubr.f32.gmra.mrb[2].mxu0 %v81_v49 }
  0xd3   :  { %v89_v6 = vpop.permute.xlu0 %88 }
  0xd4   :  { %vm96_vm4 = vcmp.eq.f32.partialorder %v85_v5, %v89_v6 }
  0xd5   :  { %v472_v17 = vsel %vm96_vm4, 1.0, %v753_v16 }
  0xd7   :  { %v94_v15 = vpop.permute.xlu0 %93 }
  0xd8   :  { %vm97_vm6 = vcmp.eq.f32.partialorder %v85_v5, %v94_v15 }
  0xd9   :  { %v473_v19 = vsel %vm97_vm6, 1.0, %v753_v16 }
 0x14c   :  { %v238_v2 = vpop.f32.mrb[0].mxu0 }
 0x14d   :  { %v239_v3 = vadd.f32 %v238_v2, %v153_v63  ;;  %v240_v4 = vpop.f32.mrb[1].mxu0 }
 0x14e   :  { %v241_v7 = vadd.f32 %v240_v4, %v157_v1 }
 0x14f   :  { %v249_v10 = vmax.f32 %v239_v3, 0.0 }
 0x150   :  { %v244_v8 = vpop.f32.mrb[2].mxu0  ;;  %v250_v9 = vmax.f32 %v241_v7, 0.0 }
 0x151   :  { %v245_v11 = vadd.f32 %v244_v8, %v153_v63  ;;  %v246_v12 = vpop.f32.mrb[3].mxu0 }
 0x152   :  { %v247_v13 = vadd.f32 %v246_v12, %v157_v1  ;;  %349 = vmatprep.mubr.f32.mxu1 %v250_v9 }
 0x153   :  { %350 = vmatmul.mubr.f32.vlgmr.msra.gmra.mrb[0].mxu1 %v249_v10  ;;  %v251_v18 = vmax.f32 %v245_v11, 0.0 }
 0x154   :  { %v252_v14 = vmax.f32 %v247_v13, 0.0  ;;  %611 = vmatpush3.bf16.msra.mxu1 %v608_v58 }
 0x156   :  { %354 = vmatprep.mubr.f32.mxu1 %v252_v14 }
 0x157   :  { %355 = vmatmul.mubr.f32.gmra.mrb[2].mxu1 %v251_v18 }
 0x158   :  { %527 = vmatprep.mubr.msk.f32.mxu1 %vm360_vm5, %v472_v17 }
 0x15b   :  { %528 = vmatmul.mubr.msk.f32.vlgmr.msra.gmra.mrb[4].mxu1 %vm360_vm5, %v473_v19 }
 0x226   :  { %v513_v20 = vpop.f32.mrb[0].mxu1 }
 0x227   :  { %v514_v21 = vpop.f32.mrb[1].mxu1 }
 0x228   :  { %v515_v22 = vadd.f32 %v514_v21, %v513_v20 }
 0x22a   :  { %v516_v23 = vpop.f32.mrb[2].mxu1 }
 0x22b   :  { %v517_v24 = vpop.f32.mrb[3].mxu1 }
 0x22c   :  { %v518_v25 = vadd.f32 %v517_v24, %v516_v23 }
 0x22e   :  { %v529_v26 = vpop.f32.mrb[4].mxu1 }
 0x22f   :  { %v439_v28 = vadd.f32 %v529_v26, %v518_v25  ;;  %v433_v29 = vpop.f32.mrb[5].mxu1 }
 0x230   :  { %v434_v30 = vadd.f32 %v515_v22, %v433_v29 }
 0x231   :  { %v450_v31 = vadd.f32 %v480_v27, %v439_v28 }
 0x232   :  { %v449_v32 = vadd.f32 %v480_v27, %v434_v30 }
 0x233   :  { %452 = vst [vmem:[#allocation10 + $0x8] sm:$0xff] %v450_v31 }
 0x234   :  { %451 = vst [vmem:[#allocation10] sm:$0xff] %v449_v32 }
 0x235   :  { %724 = shalt.err (!%p721_p8)
}
 0x236   :  { %s725_s5 = scalar_lea.hbm %s884_s6, 256 }
 0x237   :  { %p726_p9 = scmp.ne.s32.totalorder %s884_s6, %s725_s5  ;;  %p729_p10 = scmp.lt.u32.totalorder %s725_s5, %s884_s6 }
 0x239   :  { %p731_p11 = pnand %p729_p10, %p726_p9 }
 0x23b   :  { %734 = shalt.err (!%p731_p11)
}
 0x23c   :  { %464 = dma.vmem_to_hbm [thread:$0]  %s459_s26, 256, %s884_s6, [#allocation4], %s744_s7, %s744_s7, %s745_s8  }
 0x23d   :  { %741 = dma.done.wait [#allocation4], 256  }
 0x23e   :  { %742 = vsyncadd [#allocation4], 4294967040 }
 0x23f   :  { %468 = vsyncpa [#allocation3], 1 }
 0x240   :  { %469 = vsyncpa [#allocation6], 1 }
 0x241   :  { %470 = vsyncpa [#allocation9], 1 }
 0x242   :  { %471 = vsyncpa [#allocation4], 1 }

</bundles_post_ra>
